<compile_context>
chip_gen: v7x
topology: tpu7x:2x2x1
jax: 0.10.0
libtpu: 0.0.40
codegen_flags: <defaults>
</compile_context>

<pallas_src>
import functools

import jax
import jax.numpy as jnp
from jax import lax
from jax.experimental import pallas as pl
from jax.experimental.pallas import tpu as pltpu

N_PHONEMES = 41  # len(PHONEMES) stand-in (constant not given in the snippet)


def _round_up(x, m):
    return (x + m - 1) // m * m


# --------------------------- dense (M-tiled) ---------------------------------

def _dense_kernel(x_ref, w_ref, b_ref, o_ref, *, relu):
    y = jnp.dot(x_ref[...], w_ref[...], preferred_element_type=jnp.float32)
    y = y + b_ref[...]
    if relu:
        y = jnp.maximum(y, 0.0)
    o_ref[...] = y.astype(o_ref.dtype)


def dense(x, w, b, *, relu=False, tile_m=512):
    """y = x @ w + b (optional ReLU).  x:(M,K), w:(K,N), b:(1,N).  Tiled over M."""
    M, K = x.shape
    N = w.shape[1]
    Mp = _round_up(M, 8)
    tm = min(tile_m, Mp)
    Mp = _round_up(Mp, tm)
    if Mp != M:
        x = jnp.pad(x, ((0, Mp - M), (0, 0)))
    out = pl.pallas_call(
        functools.partial(_dense_kernel, relu=relu),
        out_shape=jax.ShapeDtypeStruct((Mp, N), jnp.float32),
        grid=(Mp // tm,),
        in_specs=[pl.BlockSpec((tm, K), lambda i: (i, 0)),
                  pl.BlockSpec((K, N), lambda i: (0, 0)),
                  pl.BlockSpec((1, N), lambda i: (0, 0))],
        out_specs=pl.BlockSpec((tm, N), lambda i: (i, 0)),
        compiler_params=pltpu.CompilerParams(
            dimension_semantics=("parallel",)),
    )(x, w, b)
    return out[:M] if Mp != M else out


# --------------------------- conv1 (in-kernel unfold) -------------------------

def _conv1_kernel(x_ref, w_ref, b_ref, o_ref):
    # x_ref: (T+2, F) padded input for one sequence
    # w_ref: (3, F, C) kernel taps; b_ref: (1, C); o_ref: (T, C)
    T = o_ref.shape[0]
    C = o_ref.shape[1]
    acc = jnp.zeros((T, C), jnp.float32) + b_ref[...]
    for k in range(3):                           # static unroll over taps
        xk = x_ref[pl.ds(k, T), :]               # shifted window, no HBM dup
        acc = acc + jnp.dot(xk, w_ref[k], preferred_element_type=jnp.float32)
    o_ref[...] = jnp.maximum(acc, 0.0)


def conv1_same(xp, w, b):
    """Conv1d(13->C, k=3, padding='same') + ReLU.  xp:(B, T+2, F) pre-padded."""
    B, Tp2, F = xp.shape
    T = Tp2 - 2
    C = w.shape[-1]
    return pl.pallas_call(
        _conv1_kernel,
        out_shape=jax.ShapeDtypeStruct((B, T, C), jnp.float32),
        grid=(B,),
        in_specs=[pl.BlockSpec((None, Tp2, F), lambda i: (i, 0, 0)),
                  pl.BlockSpec((3, F, C), lambda i: (0, 0, 0)),
                  pl.BlockSpec((1, C), lambda i: (0, 0))],
        out_specs=pl.BlockSpec((None, T, C), lambda i: (i, 0, 0)),
        compiler_params=pltpu.CompilerParams(
            dimension_semantics=("parallel",)),
    )(xp, w, b)


# --------------------------- LSTM recurrent kernel ----------------------------

def _lstm_rec_kernel(g_ref, whh_ref, lens_ref, o_ref, h_sc, c_sc, *, hidden):
    # g_ref:   (T, B, 4H)  precomputed X@W_ih + (b_ih + b_hh) for this direction
    # whh_ref: (H, 4H)     recurrent weights (gate order i, f, g, o)
    # lens_ref:(B, 1)      int32 valid lengths (replaces the old (T,B,H) mask)
    # o_ref:   (T, B, H)
    T = g_ref.shape[0]
    H = hidden
    d = pl.program_id(0)                 # 0 = forward, 1 = backward direction

    h_sc[...] = jnp.zeros_like(h_sc)
    c_sc[...] = jnp.zeros_like(c_sc)
    whh = whh_ref[...]                   # loop-invariant
    lens = lens_ref[...]                 # (B, 1) int32, loop-invariant

    def step(s, carry):
        # t = s (forward) or T-1-s (backward), pure integer arithmetic
        t = s + d * (T - 1 - 2 * s)
        gates = g_ref[t] + jnp.dot(h_sc[...], whh,
                                   preferred_element_type=jnp.float32)
        # TODO(synk): for H >= 128, lay gates out (4, H) to keep slices aligned.
        i_g = jax.nn.sigmoid(gates[:, 0 * H:1 * H])
        f_g = jax.nn.sigmoid(gates[:, 1 * H:2 * H])
        g_g = jnp.tanh(gates[:, 2 * H:3 * H])
        o_g = jax.nn.sigmoid(gates[:, 3 * H:4 * H])
        c = f_g * c_sc[...] + i_g * g_g
        h = o_g * jnp.tanh(c)
        # pack/pad semantics: zero hidden/cell/output past each sequence length
        m = (t < lens).astype(jnp.float32)          # (B, 1)
        h = h * m
        c = c * m
        h_sc[...] = h
        c_sc[...] = c
        o_ref[t] = h.astype(o_ref.dtype)
        return carry

    lax.fori_loop(0, T, step, 0)


def lstm_layer(g, whh, lens, hidden):
    """One (bi)LSTM layer.  g:(D,T,B,4H) precomputed gates, whh:(D,H,4H)."""
    D, T, B, G4 = g.shape
    return pl.pallas_call(
        functools.partial(_lstm_rec_kernel, hidden=hidden),
        out_shape=jax.ShapeDtypeStruct((D, T, B, hidden), jnp.float32),
        grid=(D,),                        # directions independent -> parallel
        in_specs=[pl.BlockSpec((None, T, B, G4), lambda d: (d, 0, 0, 0)),
                  pl.BlockSpec((None, hidden, G4), lambda d: (d, 0, 0)),
                  pl.BlockSpec((B, 1), lambda d: (0, 0))],
        out_specs=pl.BlockSpec((None, T, B, hidden), lambda d: (d, 0, 0, 0)),
        scratch_shapes=[pltpu.VMEM((B, hidden), jnp.float32),
                        pltpu.VMEM((B, hidden), jnp.float32)],
        compiler_params=pltpu.CompilerParams(
            dimension_semantics=("parallel",)),
    )(g, whh, lens)


# --------------------------- fused MLP head -----------------------------------

def _mlp_kernel(*refs, n_layers):
    x_ref = refs[0]
    o_ref = refs[-1]
    h = x_ref[...]
    for i in range(n_layers):
        w = refs[1 + 2 * i][...]
        b = refs[2 + 2 * i][...]
        h = jnp.dot(h, w, preferred_element_type=jnp.float32) + b
        if i < n_layers - 1:              # ReLU after every hidden linear
            h = jnp.maximum(h, 0.0)
    o_ref[...] = h.astype(o_ref.dtype)


def mlp_head(x, mlp_params, *, tile_m=512):
    """Fused Linear/ReLU stack: one pallas_call, lane-dense (128-padded) output."""
    M, feat = x.shape
    n_layers = len(mlp_params)
    w_last, b_last = mlp_params[-1]
    n_out = w_last.shape[1]
    n_pad = _round_up(n_out, 128)
    if n_pad != n_out:                    # pad classifier width -> unmasked vst
        w_last = jnp.pad(w_last, ((0, 0), (0, n_pad - n_out)))
        b_last = jnp.pad(b_last, ((0, 0), (0, n_pad - n_out)))
    wbs = list(mlp_params[:-1]) + [(w_last, b_last)]

    Mp = _round_up(M, 8)
    tm = min(tile_m, Mp)
    Mp = _round_up(Mp, tm)
    if Mp != M:
        x = jnp.pad(x, ((0, Mp - M), (0, 0)))

    flat_args = []
    in_specs = [pl.BlockSpec((tm, feat), lambda i: (i, 0))]
    for (w, b) in wbs:
        flat_args += [w, b]
        in_specs += [pl.BlockSpec(w.shape, lambda i: (0, 0)),
                     pl.BlockSpec(b.shape, lambda i: (0, 0))]

    out = pl.pallas_call(
        functools.partial(_mlp_kernel, n_layers=n_layers),
        out_shape=jax.ShapeDtypeStruct((Mp, n_pad), jnp.float32),
        grid=(Mp // tm,),
        in_specs=in_specs,
        out_specs=pl.BlockSpec((tm, n_pad), lambda i: (i, 0)),
        compiler_params=pltpu.CompilerParams(
            dimension_semantics=("parallel",)),
    )(x, *flat_args)
    return out[:M, :n_out]


# --------------------------- parameters ---------------------------------------

def init_params(seed, cnn_channels, n_lstm_layers, bidirectional, mlp_sizes):
    key = jax.random.PRNGKey(seed)

    def nxt():
        nonlocal key
        key, k = jax.random.split(key)
        return k

    C = cnn_channels
    H = 2 * C
    D = 2 if bidirectional else 1
    p = {"cnn_channels": C, "bidirectional": bidirectional}

    # Conv1d(13 -> C, k=3, padding='same'): taps laid out (3, 13, C)
    p["w1"] = 0.1 * jax.random.normal(nxt(), (3, 13, C), jnp.float32)
    p["b1"] = 0.1 * jax.random.normal(nxt(), (1, C), jnp.float32)
    # Conv1d(C -> 2C, k=3, stride=3): flat weight (3*C, 2C)
    p["w2"] = 0.1 * jax.random.normal(nxt(), (3 * C, 2 * C), jnp.float32)
    p["b2"] = 0.1 * jax.random.normal(nxt(), (1, 2 * C), jnp.float32)

    lstm = []
    in_size = 2 * C
    for _layer in range(n_lstm_layers):
        # Both directions' input weights concatenated along N -> one big matmul.
        wih = 0.1 * jax.random.normal(nxt(), (in_size, D * 4 * H), jnp.float32)
        b = 0.1 * jax.random.normal(nxt(), (1, D * 4 * H), jnp.float32)  # b_ih+b_hh
        whh = 0.1 * jax.random.normal(nxt(), (D, H, 4 * H), jnp.float32)
        lstm.append({"wih": wih, "b": b, "whh": whh})
        in_size = D * H
    p["lstm"] = lstm

    mlp = []
    sizes = [D * H] + list(mlp_sizes) + [N_PHONEMES]
    for i in range(len(sizes) - 1):
        w = 0.1 * jax.random.normal(nxt(), (sizes[i], sizes[i + 1]), jnp.float32)
        b = 0.1 * jax.random.normal(nxt(), (1, sizes[i + 1]), jnp.float32)
        mlp.append((w, b))
    p["mlp"] = mlp
    return p


# --------------------------- forward -------------------------------------------

def model1_forward(params, x, seq_lengths):
    """x: (B, T, 13) float32; seq_lengths: python list of ints."""
    B, T, F = x.shape
    C = params["cnn_channels"]
    D = 2 if params["bidirectional"] else 1
    H = 2 * C

    # ---- cnn_1: Conv1d(13->C, k=3, padding='same') + ReLU (in-kernel unfold)
    xp = jnp.pad(x, ((0, 0), (1, 1), (0, 0)))           # (B, T+2, F)
    h = conv1_same(xp, params["w1"], params["b1"])      # (B, T, C)

    # ---- cnn_2: Conv1d(C->2C, k=3, stride=3) + ReLU (free reshape + tiled dense)
    T2 = (T - 3) // 3 + 1
    h = h[:, :3 * T2, :].reshape(B * T2, 3 * C)
    h = dense(h, params["w2"], params["b2"], relu=True).reshape(B, T2, 2 * C)

    # ---- pack_padded_sequence / LSTM / pad_packed_sequence (length masking)
    down = [(int(l) - 3) // 3 for l in seq_lengths]     # matches the PyTorch code
    Tp = max(down)
    lens = jnp.asarray(down, dtype=jnp.int32).reshape(B, 1)
    h = h[:, :Tp, :]
    xseq = jnp.transpose(h, (1, 0, 2))                  # (Tp, B, 2C) time-major

    for layer in params["lstm"]:
        Cin = xseq.shape[-1]
        # Hoisted input projection for all timesteps and both directions:
        g = dense(xseq.reshape(Tp * B, Cin), layer["wih"], layer["b"])
        g = g.reshape(Tp, B, D, 4 * H).transpose(2, 0, 1, 3)   # (D, Tp, B, 4H)
        o = lstm_layer(g, layer["whh"], lens, H)                # (D, Tp, B, H)
        xseq = jnp.transpose(o, (1, 2, 0, 3)).reshape(Tp, B, D * H)

    seq_out = jnp.transpose(xseq, (1, 0, 2)).reshape(B * Tp, D * H)

    # ---- fused MLP head (dropout = identity at inference)
    out = mlp_head(seq_out, params["mlp"]).reshape(B, Tp, N_PHONEMES)
    return out, down


# --------------------------- main ----------------------------------------------

if __name__ == "__main__":
    cnn_channels = 8
    n_lstm_layers = 2
    bidirectional = True
    mlp_sizes = [32, 24]

    params = init_params(0, cnn_channels, n_lstm_layers, bidirectional, mlp_sizes)

    key = jax.random.PRNGKey(0)
    B, T, F = 2, 18, 13
    x = jax.random.normal(key, (B, T, F), jnp.float32)
    seq_lengths = [18, 12]

    out, down = model1_forward(params, x, seq_lengths)
    out = jax.block_until_ready(out)

    assert out.shape == (B, max(down), N_PHONEMES), out.shape
    assert down == [(l - 3) // 3 for l in seq_lengths]
    assert bool(jnp.all(jnp.isfinite(out)))
    print("KERNEL_OK")
</pallas_src>

<mosaic_0001>
module attributes {stable_mosaic.version = 11 : i64} {
  func.func @_conv1_kernel(%arg0: i32, %arg1: memref<1x20x13xf32, #tpu.memory_space<vmem>>, %arg2: memref<3x13x8xf32, #tpu.memory_space<vmem>>, %arg3: memref<1x8xf32, #tpu.memory_space<vmem>>, %arg4: memref<1x18x8xf32, #tpu.memory_space<vmem>>) attributes {dimension_semantics = [#tpu.dimension_semantics<parallel>], iteration_bounds = array<i64: 2>, scalar_prefetch = 0 : i64, scratch_operands = 0 : i64, tpu.core_type = #tpu.core_type<tc>, window_params = [{transform_indices = @transform_0, window_bounds = array<i64: 1, 20, 13>}, {pipeline_mode = #tpu.pipeline_mode<synchronous>, transform_indices = @transform_1, window_bounds = array<i64: 3, 13, 8>}, {pipeline_mode = #tpu.pipeline_mode<synchronous>, transform_indices = @transform_2, window_bounds = array<i64: 1, 8>}, {transform_indices = @transform_3, window_bounds = array<i64: 1, 18, 8>}]} {
    %cst = arith.constant 0.000000e+00 : f32
    %0 = vector.broadcast %cst : f32 to vector<18x8xf32>
    %c0 = arith.constant 0 : index
    %c0_0 = arith.constant 0 : index
    %1 = vector.load %arg3[%c0, %c0_0] : memref<1x8xf32, #tpu.memory_space<vmem>>, vector<1x8xf32>
    %2 = vector.broadcast %1 : vector<1x8xf32> to vector<18x8xf32>
    %3 = arith.addf %0, %2 : vector<18x8xf32>
    %c0_1 = arith.constant 0 : index
    %c0_2 = arith.constant 0 : index
    %c0_3 = arith.constant 0 : index
    %4 = vector.load %arg1[%c0_1, %c0_2, %c0_3] : memref<1x20x13xf32, #tpu.memory_space<vmem>>, vector<1x18x13xf32>
    %5 = vector.shape_cast %4 : vector<1x18x13xf32> to vector<18x13xf32>
    %c0_4 = arith.constant 0 : index
    %c0_5 = arith.constant 0 : index
    %c0_6 = arith.constant 0 : index
    %6 = vector.load %arg2[%c0_4, %c0_5, %c0_6] : memref<3x13x8xf32, #tpu.memory_space<vmem>>, vector<1x13x8xf32>
    %7 = vector.shape_cast %6 : vector<1x13x8xf32> to vector<13x8xf32>
    %cst_7 = arith.constant dense<0.000000e+00> : vector<18x8xf32>
    %8 = tpu.matmul %5, %7, %cst_7 {dimension_numbers = #tpu.dot_dimension_numbers<[1], [0], [0], [1], [0, 0, 1, 1], [], []>} : vector<18x13xf32>, vector<13x8xf32>, vector<18x8xf32> -> vector<18x8xf32>
    %9 = arith.addf %3, %8 : vector<18x8xf32>
    %c0_8 = arith.constant 0 : index
    %c1 = arith.constant 1 : index
    %c0_9 = arith.constant 0 : index
    %10 = vector.load %arg1[%c0_8, %c1, %c0_9] : memref<1x20x13xf32, #tpu.memory_space<vmem>>, vector<1x18x13xf32>
    %11 = vector.shape_cast %10 : vector<1x18x13xf32> to vector<18x13xf32>
    %c1_10 = arith.constant 1 : index
    %c0_11 = arith.constant 0 : index
    %c0_12 = arith.constant 0 : index
    %12 = vector.load %arg2[%c1_10, %c0_11, %c0_12] : memref<3x13x8xf32, #tpu.memory_space<vmem>>, vector<1x13x8xf32>
    %13 = vector.shape_cast %12 : vector<1x13x8xf32> to vector<13x8xf32>
    %cst_13 = arith.constant dense<0.000000e+00> : vector<18x8xf32>
    %14 = tpu.matmul %11, %13, %cst_13 {dimension_numbers = #tpu.dot_dimension_numbers<[1], [0], [0], [1], [0, 0, 1, 1], [], []>} : vector<18x13xf32>, vector<13x8xf32>, vector<18x8xf32> -> vector<18x8xf32>
    %15 = arith.addf %9, %14 : vector<18x8xf32>
    %c0_14 = arith.constant 0 : index
    %c2 = arith.constant 2 : index
    %c0_15 = arith.constant 0 : index
    %16 = vector.load %arg1[%c0_14, %c2, %c0_15] : memref<1x20x13xf32, #tpu.memory_space<vmem>>, vector<1x18x13xf32>
    %17 = vector.shape_cast %16 : vector<1x18x13xf32> to vector<18x13xf32>
    %c2_16 = arith.constant 2 : index
    %c0_17 = arith.constant 0 : index
    %c0_18 = arith.constant 0 : index
    %18 = vector.load %arg2[%c2_16, %c0_17, %c0_18] : memref<3x13x8xf32, #tpu.memory_space<vmem>>, vector<1x13x8xf32>
    %19 = vector.shape_cast %18 : vector<1x13x8xf32> to vector<13x8xf32>
    %cst_19 = arith.constant dense<0.000000e+00> : vector<18x8xf32>
    %20 = tpu.matmul %17, %19, %cst_19 {dimension_numbers = #tpu.dot_dimension_numbers<[1], [0], [0], [1], [0, 0, 1, 1], [], []>} : vector<18x13xf32>, vector<13x8xf32>, vector<18x8xf32> -> vector<18x8xf32>
    %21 = arith.addf %15, %20 : vector<18x8xf32>
    %cst_20 = arith.constant 0.000000e+00 : f32
    %22 = vector.broadcast %cst_20 : f32 to vector<18x8xf32>
    %23 = arith.maximumf %21, %22 : vector<18x8xf32>
    %c0_21 = arith.constant 0 : index
    %c0_22 = arith.constant 0 : index
    %c0_23 = arith.constant 0 : index
    %24 = vector.load %arg4[%c0_21, %c0_22, %c0_23] : memref<1x18x8xf32, #tpu.memory_space<vmem>>, vector<1x18x8xf32>
    %25 = vector.shape_cast %24 : vector<1x18x8xf32> to vector<18x8xf32>
    %26 = vector.shape_cast %23 : vector<18x8xf32> to vector<1x18x8xf32>
    tpu.vector_store %arg4[%c0_21, %c0_22, %c0_23], %26 {strides = array<i32>} : memref<1x18x8xf32, #tpu.memory_space<vmem>>, vector<1x18x8xf32>,
    return
  }
  func.func @transform_0(%arg0: i32) -> (i32, i32, i32) {
    %c0_i32 = arith.constant 0 : i32
    %c0_i32_0 = arith.constant 0 : i32
    %c0_i32_1 = arith.constant 0 : i32
    return %arg0, %c0_i32, %c0_i32_0 : i32, i32, i32
  }
  func.func @transform_1(%arg0: i32) -> (i32, i32, i32) {
    %c0_i32 = arith.constant 0 : i32
    %c0_i32_0 = arith.constant 0 : i32
    %c0_i32_1 = arith.constant 0 : i32
    %c0_i32_2 = arith.constant 0 : i32
    return %c0_i32, %c0_i32_0, %c0_i32_1 : i32, i32, i32
  }
  func.func @transform_2(%arg0: i32) -> (i32, i32) {
    %c0_i32 = arith.constant 0 : i32
    %c0_i32_0 = arith.constant 0 : i32
    %c0_i32_1 = arith.constant 0 : i32
    return %c0_i32, %c0_i32_0 : i32, i32
  }
  func.func @transform_3(%arg0: i32) -> (i32, i32, i32) {
    %c0_i32 = arith.constant 0 : i32
    %c0_i32_0 = arith.constant 0 : i32
    %c0_i32_1 = arith.constant 0 : i32
    return %arg0, %c0_i32, %c0_i32_0 : i32, i32, i32
  }
}

</mosaic_0001>

<bundles_post_ra>
// kernel: tpu_custom_call.1
= control target key start
LH: loop header
LB: loop body
LE: loop exit
PB: predicated region body
PF: predicated region fallthrough
CT: control target
= control target key end

     0   :  { %s697_s12 = smov 0   ;;  %s772_s0 = inlined_call_operand.vmem [shape: f32[2,20,13], index: 0, kind: input, shape index: {}]   ;;  %s773_s1 = inlined_call_operand.vmem [shape: f32[3,13,8], index: 1, kind: input, shape index: {}]   ;;  %s774_s2 = inlined_call_operand.vmem [shape: f32[1,8], index: 2, kind: input, shape index: {}]   ;;  %s775_s3 = inlined_call_operand.vmem [shape: f32[2,18,8], index: 3, kind: output, shape index: {}]  }
   0x1 LB: > { %s546_s13 = sadd.s32 4294967295, %s671_s12   ;;  %p550_p0 = scmp.ge.s32.totalorder %s671_s12, 1  ;;  %s671_s12 = sphi %s697_s12, %s13_s12  }
   0x2   : > { %p137_p1 = scmp.lt.s32.totalorder %s671_s12, 3 }
   0x4   : > { %p138_p2 = pnand %p550_p0, %p137_p1 }
   0x5   : > { %v182_v0 = vld [vmem:[%s773_s1] sm:$0xff] (!%p138_p2)  ;;  %v183_v1 = vld [vmem:[%s773_s1 + $0x8] sm:$0x1f] (!%p138_p2)  ;;  %vm194_vm0 = vcmask (!%p138_p2), 1044480   ;;  %v673_v2 = vmov (!%p138_p2), 0.0|0.0   ;;  %vm674_vm1 = vmmov (!%p138_p2), 1  }
   0x6   : > { %141 = sbr.rel (%p138_p2) target bundleno = 253 (0xfd), region = 32  ;;  %626 = vmatprep.subr.bf16.mxu1 (!%p138_p2), %v673_v2  ;;  %v627_v3 = vpack.c.bf16 (!%p138_p2), %v183_v1, %v182_v0  ;;  %vm711_vm2 = vmpackc.low (!%p138_p2), %vm194_vm0, %vm674_vm1  ;;  %630 = vmatprep.subr.bf16.mxu0 (!%p138_p2), %v673_v2  ;;  %v558_v5 = vld [vmem:[%s773_s1 + $0x10] sm:$0xff] (!%p138_p2)  ;;  %v559_v6 = vld [vmem:[%s773_s1 + $0x18] sm:$0x1f] (!%p138_p2)  ;;  %p161_p3 = scmp.lt.s32.totalorder (!%p138_p2), %s546_s13, 1  ;;  %vm675_vm3 = vmmov (!%p138_p2), 0  }
   0x7   : > { %v631_v7 = vpack.c.bf16 (!%p138_p2), %v559_v6, %v558_v5  ;;  %v676_v8 = vmov (!%p138_p2), 0.0   ;;  %v564_v9 = vld [vmem:[%s773_s1 + $0x20] sm:$0xff] (!%p138_p2)  ;;  %v565_v10 = vld [vmem:[%s773_s1 + $0x28] sm:$0x1f] (!%p138_p2)  ;;  %vm184_vm4 = vcmask (!%p138_p2), 105472   ;;  %vm486_vm5 = vcmask (!%p138_p2), 64512  }
   0x8   : > { %591 = vmatprep.mubr.msk.f32.mxu1 (!%p138_p2), %vm675_vm3, %v676_v8  ;;  %604 = vmatprep.mubr.msk.f32.mxu0 (!%p138_p2), %vm675_vm3, %v676_v8  ;;  %v635_v11 = vpack.c.bf16 (!%p138_p2), %v565_v10, %v564_v9  ;;  %v553_v23 = vld [vmem:[%s774_s2] ss:$0 sm:$0xff] (!%p138_p2)  ;;  %vm489_vm6 = vcmask (!%p138_p2), 58368  }
   0x9   : > { %629 = vmatpush3.bf16.msk.msra.mxu1 (!%p138_p2), %vm711_vm2, %v627_v3  ;;  %633 = vmatpush3.bf16.msk.msra.mxu0 (!%p138_p2), %vm711_vm2, %v631_v7 }
   0xa   : > { %638 = vmatprep.subr.bf16.mxu1 (!%p138_p2), %v673_v2  ;;  %634 = vmatprep.subr.bf16.mxu0 (!%p138_p2), %v673_v2 }
   0xd   : > { %s779_s13 = smov (!%p161_p3, %s546_s13), 1 }
   0xe   : > { %s652_s26 = smul.u32 24, %s779_s13 }
  0x10   : > { %s165_s29 = scalar_lea.vmem %s772_s0, %s652_s26  ;;  %s170_s7 = scalar_lea.vmem %s775_s3, %s652_s26 }
  0x11   : > { %v179_v12 = vld [vmem:[%s165_s29] sm:$0xff]  ;;  %v180_v14 = vld [vmem:[%s165_s29 + $0x8] sm:$0xff]  ;;  %v181_v15 = vld [vmem:[%s165_s29 + $0x10] sm:$0x3] }
  0x12   : > { %v281_v13 = vld [vmem:[%s165_s29 + $0x1] sm:$0xff]  ;;  %592 = vmatmul.mubr.msk.f32.vlgmr.msra.gmra.mrb[0].mxu1 %vm184_vm4, %v179_v12  ;;  %v282_v17 = vld [vmem:[%s165_s29 + $0x9] sm:$0xff]  ;;  %v283_v19 = vld [vmem:[%s165_s29 + $0x11] sm:$0x3] }
  0x13   : > { %605 = vmatmul.mubr.msk.f32.vlgmr.msra.gmra.mrb[0].mxu0 %vm184_vm4, %v281_v13  ;;  %639 = vmatpush3.bf16.msk.msra.mxu1 %vm711_vm2, %v631_v7  ;;  %v382_v16 = vld [vmem:[%s165_s29 + $0x2] sm:$0xff]  ;;  %v383_v18 = vld [vmem:[%s165_s29 + $0xa] sm:$0xff]  ;;  %v384_v20 = vld [vmem:[%s165_s29 + $0x12] sm:$0x3] }
  0x14   : > { %637 = vmatpush3.bf16.msk.msra.mxu0 %vm711_vm2, %v635_v11  ;;  %594 = vmatprep.mubr.msk.f32.mxu1 %vm675_vm3, %v676_v8 }
  0x15   : > { %617 = vmatprep.mubr.msk.f32.mxu0 %vm675_vm3, %v676_v8 }
  0x16   : > { %595 = vmatmul.mubr.msk.f32.gmra.mrb[2].mxu1 %vm184_vm4, %v180_v14 }
  0x17   : > { %597 = vmatprep.mubr.msk.f32.mxu1 %vm675_vm3, %v676_v8 }
  0x1a   : > { %598 = vmatmul.mubr.msk.f32.gmra.mrb[4].mxu1 %vm184_vm4, %v181_v15 }
  0x1b   : > { %618 = vmatmul.mubr.msk.f32.vlgmr.msra.gmra.mrb[0].mxu0 %vm184_vm4, %v382_v16  ;;  %607 = vmatprep.mubr.msk.f32.mxu1 %vm675_vm3, %v676_v8 }
  0x1c   : > { %620 = vmatprep.mubr.msk.f32.mxu0 %vm675_vm3, %v676_v8 }
  0x1e   : > { %608 = vmatmul.mubr.msk.f32.vlgmr.msra.gmra.mrb[2].mxu1 %vm184_vm4, %v282_v17 }
  0x1f   : > { %621 = vmatmul.mubr.msk.f32.gmra.mrb[2].mxu0 %vm184_vm4, %v383_v18  ;;  %610 = vmatprep.mubr.msk.f32.mxu1 %vm675_vm3, %v676_v8 }
  0x20   : > { %623 = vmatprep.mubr.msk.f32.mxu0 %vm675_vm3, %v676_v8 }
  0x22   : > { %611 = vmatmul.mubr.msk.f32.gmra.mrb[4].mxu1 %vm184_vm4, %v283_v19 }
  0x23   : > { %624 = vmatmul.mubr.msk.f32.gmra.mrb[4].mxu0 %vm184_vm4, %v384_v20 }
  0xe5   : > { %v264_v21 = vpop.f32.mrb[0].mxu1 }
  0xe6   : > { %v593_v22 = vpop.f32.mrb[1].mxu1  ;;  %v278_v24 = vadd.f32 %v553_v23, %v264_v21 }
  0xee   : > { %v466_v25 = vpop.f32.mrb[0].mxu0 }
  0xef   : > { %v641_v26 = vadd.f32 %v466_v25, %v278_v24  ;;  %v619_v27 = vpop.f32.mrb[1].mxu0 }
  0xf1   : > { %v483_v28 = vmax.f32 %v641_v26, 0.0  ;;  %v370_v29 = vpop.f32.mrb[2].mxu1 }
  0xf2   : > { %v471_v30 = vpop.f32.mrb[2].mxu0  ;;  %v642_v31 = vadd.f32 %v553_v23, %v370_v29  ;;  %v609_v32 = vpop.f32.mrb[3].mxu1 }
  0xf3   : > { %487 = vst.msk [vmem:[%s170_s7] sm:$0xff] %vm486_vm5, %v483_v28  ;;  %v622_v33 = vpop.f32.mrb[3].mxu0 }
  0xf4   : > { %v643_v34 = vadd.f32 %v642_v31, %v471_v30 }
  0xf5   : > { %v375_v35 = vpop.f32.mrb[4].mxu1 }
  0xf6   : > { %v476_v36 = vpop.f32.mrb[4].mxu0  ;;  %v484_v37 = vmax.f32 %v643_v34, 0.0  ;;  %v644_v38 = vadd.f32 %v553_v23, %v375_v35  ;;  %v612_v39 = vpop.f32.mrb[5].mxu1 }
  0xf7   : > { %v625_v40 = vpop.f32.mrb[5].mxu0 }
  0xf8   : > { %488 = vst.msk [vmem:[%s170_s7 + $0x8] sm:$0xff] %vm486_vm5, %v484_v37  ;;  %v645_v41 = vadd.f32 %v644_v38, %v476_v36 }
  0xfa   : > { %v485_v42 = vmax.f32 %v645_v41, 0.0 }
  0xfc   : > { %490 = vst.msk [vmem:[%s170_s7 + $0x10] sm:$0x3] %vm489_vm6, %v485_v42 }
  0xfd PF: > { %s13_s12 = sadd.s32 1, %s671_s12  }
  0xfe   : > { %p10_p4 = scmp.ge.s32.totalorder %s13_s12, 4  }
 0x100   :  { %12 = sbr.rel (!%p10_p4) target bundleno = 1 (0x1), region = 64 }

</bundles_post_ra>
